<compile_context>
chip_gen: v7x
topology: tpu7x:2x2x1
jax: 0.10.0
libtpu: 0.0.40
codegen_flags: <defaults>
</compile_context>

<pallas_src>
import jax
import jax.numpy as jnp
import numpy as np
from jax.experimental import pallas as pl
from jax.experimental.pallas import tpu as pltpu


def _round_up(x, m):
    return (x + m - 1) // m * m


def _cdiv(a, b):
    return (a + b - 1) // b


def _make_kernel(TB, Lp, L, F3p):
    """Per-grid-step kernel: TB batch elements, each a padded Lp-row segment.
    L is the original drug length; the max pool covers the first L-15 rows of
    each segment (the only rows whose conv windows see exclusively real data)."""
    L3 = L - 15
    N = TB * Lp  # constant, 8-aligned row count for every layer

    def conv_relu(h, w_ref, b_ref, K):
        # h:     (N, Cin)      f32 activations (flat over batch*position)
        # w_ref: (K*Cin, Cout) bf16 flattened conv weight (tap-major)
        # b_ref: (1, Cout)     f32 bias
        Cin = w_ref.shape[0] // K
        hb = h.astype(w_ref.dtype)
        # 8 garbage rows keep every shifted tap slice in range so the output
        # row count stays at N.  Garbage only lands in rows that are never
        # read by a later layer's valid window or by the max pool.
        hpad = jnp.concatenate([hb, jnp.zeros((8, Cin), hb.dtype)], axis=0)
        acc = jnp.dot(hb, w_ref[0:Cin, :], preferred_element_type=jnp.float32)
        for k in range(1, K):  # K <= 8, static unroll
            acc = acc + jnp.dot(hpad[k:k + N, :],
                                w_ref[k * Cin:(k + 1) * Cin, :],
                                preferred_element_type=jnp.float32)
        return jnp.maximum(acc + b_ref[...], 0.0)  # f32 bias + ReLU

    def kernel(tok_ref, emb_ref, w1_ref, b1_ref, w2_ref, b2_ref,
               w3_ref, b3_ref, o_ref):
        charlen = emb_ref.shape[0]

        # Fused embedding lookup as a one-hot matmul on the MXU.
        tok = tok_ref[...]                                          # (N, 1) int32
        ids = jax.lax.broadcasted_iota(jnp.int32, (N, charlen), 1)  # (N, charlen)
        onehot = (tok == ids).astype(emb_ref.dtype)                 # bf16
        x = jnp.dot(onehot, emb_ref[...],
                    preferred_element_type=jnp.float32)             # (N, E) f32

        h1 = conv_relu(x, w1_ref, b1_ref, 4)                        # (N, F)
        h2 = conv_relu(h1, w2_ref, b2_ref, 6)                       # (N, 2F)
        h3 = conv_relu(h2, w3_ref, b3_ref, 8)                       # (N, F3p)

        # MaxPool1d(L-15): one masked reduction over the whole block instead
        # of a TB-way unrolled per-batch max.  Invalid rows (p >= L-15) are
        # zeroed, which is neutral because post-ReLU values are >= 0.
        h3r = h3.reshape(TB, Lp, F3p)
        pos = jax.lax.broadcasted_iota(jnp.int32, (TB, Lp, F3p), 1)
        masked = jnp.where(pos < L3, h3r, 0.0)
        o_ref[...] = jnp.max(masked, axis=1)[None]                  # (1, TB, F3p)

    return kernel


def drug_model_forward(x_tokens, params, *, block_b=64):
    """x_tokens: (B, L) int token indices. Returns (B, 3*num_filters, 1) float32."""
    emb = params["embedding"]                    # (charlen, E) f32
    w1, b1 = params["w1"], params["b1"]          # (4, E,  F ), (1, F )
    w2, b2 = params["w2"], params["b2"]          # (6, F,  2F), (1, 2F)
    w3, b3 = params["w3"], params["b3"]          # (8, 2F, 3F), (1, 3F)

    B, L = x_tokens.shape
    charlen, E = emb.shape
    F3 = w3.shape[-1]
    assert L >= 16, "DrugModel requires druglen >= 16 (MaxPool1d(druglen - 15))"

    Lp = _round_up(L, 8)             # sequence length padded to 8 sublanes
    F3p = _round_up(F3, 128)         # final Cout padded to full lanes

    # Batch blocking: at most one partial block of padding, and >= 2 grid
    # steps whenever B >= 2 so the "parallel" axis can use both v7x cores.
    min_steps = 2 if B >= 2 else 1
    n_steps = max(min_steps, _cdiv(B, block_b))
    TB = _cdiv(B, n_steps)
    Bp = n_steps * TB

    # Pad tokens (pad value 0 is a valid vocab index; padded rows/batches are
    # never read by the valid max-pool windows / final slice).
    tok = jnp.zeros((Bp, Lp), jnp.int32).at[:B, :L].set(x_tokens.astype(jnp.int32))
    tok_flat = tok.reshape(Bp * Lp, 1)

    cdt = jnp.bfloat16
    emb_b = emb.astype(cdt)                                          # (charlen, E)
    w1f = w1.reshape(-1, w1.shape[-1]).astype(cdt)                   # (4E,  F)
    w2f = w2.reshape(-1, w2.shape[-1]).astype(cdt)                   # (6F,  2F)
    w3f = jnp.pad(w3, ((0, 0), (0, 0), (0, F3p - F3))
                  ).reshape(-1, F3p).astype(cdt)                     # (16F, F3p)
    b1f = b1.astype(jnp.float32)
    b2f = b2.astype(jnp.float32)
    b3f = jnp.pad(b3.astype(jnp.float32), ((0, 0), (0, F3p - F3)))   # (1, F3p)

    kernel = _make_kernel(TB=TB, Lp=Lp, L=L, F3p=F3p)

    out = pl.pallas_call(
        kernel,
        out_shape=jax.ShapeDtypeStruct((n_steps, TB, F3p), jnp.float32),
        grid_spec=pltpu.PrefetchScalarGridSpec(
            num_scalar_prefetch=0,
            grid=(n_steps,),
            in_specs=[
                pl.BlockSpec((TB * Lp, 1), lambda i: (i, 0)),        # tokens
                pl.BlockSpec(emb_b.shape, lambda i: (0, 0)),         # embedding
                pl.BlockSpec(w1f.shape, lambda i: (0, 0)),
                pl.BlockSpec(b1f.shape, lambda i: (0, 0)),
                pl.BlockSpec(w2f.shape, lambda i: (0, 0)),
                pl.BlockSpec(b2f.shape, lambda i: (0, 0)),
                pl.BlockSpec(w3f.shape, lambda i: (0, 0)),
                pl.BlockSpec(b3f.shape, lambda i: (0, 0)),
            ],
            out_specs=pl.BlockSpec((1, TB, F3p), lambda i: (i, 0, 0)),
        ),
        compiler_params=pltpu.CompilerParams(
            dimension_semantics=("parallel",),
            vmem_limit_bytes=48 * 1024 * 1024,   # headroom for TB=64 at big shapes
        ),
    )(tok_flat, emb_b, w1f, b1f, w2f, b2f, w3f, b3f)

    # (n_steps, TB, F3p) -> (B, 3F, 1) matching PyTorch MaxPool1d output layout.
    return out.reshape(Bp, F3p)[:B, :F3].reshape(B, F3, 1)


def drug_model_reference(x_tokens, params):
    """Pure-JAX f32 reference matching the PyTorch forward."""
    x = jnp.take(params["embedding"], x_tokens, axis=0)             # (B, L, E)

    def conv_relu(h, w, b):                                         # w: (K, Cin, Cout)
        K = w.shape[0]
        Lout = h.shape[1] - K + 1
        acc = sum(jnp.einsum("blc,co->blo", h[:, k:k + Lout, :], w[k])
                  for k in range(K))
        return jnp.maximum(acc + b[0], 0.0)

    h = conv_relu(x, params["w1"], params["b1"])
    h = conv_relu(h, params["w2"], params["b2"])
    h = conv_relu(h, params["w3"], params["b3"])
    return jnp.max(h, axis=1)[:, :, None]                           # (B, 3F, 1)


def init_params(key, charlen, embedding_dim, num_filters):
    """Deterministic synthetic parameters matching the nn.Module shapes.
    Conv weights stored as (K, Cin, Cout) (transposed from torch's (Cout, Cin, K))."""
    ks = jax.random.split(key, 7)
    E, F = embedding_dim, num_filters

    def conv_w(k, K, cin, cout):
        bound = 1.0 / jnp.sqrt(cin * K)
        return jax.random.uniform(k, (K, cin, cout), jnp.float32, -bound, bound)

    def conv_b(k, K, cin, cout):
        bound = 1.0 / jnp.sqrt(cin * K)
        return jax.random.uniform(k, (1, cout), jnp.float32, -bound, bound)

    return {
        "embedding": jax.random.normal(ks[0], (charlen, E), jnp.float32),
        "w1": conv_w(ks[1], 4, E, F),         "b1": conv_b(ks[2], 4, E, F),
        "w2": conv_w(ks[3], 6, F, 2 * F),     "b2": conv_b(ks[4], 6, F, 2 * F),
        "w3": conv_w(ks[5], 8, 2 * F, 3 * F), "b3": conv_b(ks[6], 8, 2 * F, 3 * F),
    }


if __name__ == "__main__":
    charlen = 32
    embedding_dim = 32
    num_filters = 8
    druglen = 32
    batch = 2

    key = jax.random.PRNGKey(0)
    pkey, xkey = jax.random.split(key)
    params = init_params(pkey, charlen, embedding_dim, num_filters)

    x_tokens = jax.random.randint(xkey, (batch, druglen), 0, charlen, dtype=jnp.int32)

    out = drug_model_forward(x_tokens, params)
    out = jax.block_until_ready(out)

    assert out.shape == (batch, 3 * num_filters, 1), out.shape
    assert out.dtype == jnp.float32

    # Loose tolerance: kernel uses bf16 MXU inputs with f32 accumulation.
    ref = jax.block_until_ready(drug_model_reference(x_tokens, params))
    assert np.allclose(np.asarray(out), np.asarray(ref), rtol=5e-2, atol=5e-2), (
        np.max(np.abs(np.asarray(out) - np.asarray(ref))))

    print("KERNEL_OK")
</pallas_src>

<mosaic_0001>
module attributes {stable_mosaic.version = 11 : i64} {
  func.func @kernel(%arg0: i32, %arg1: memref<32x1xi32, #tpu.memory_space<vmem>>, %arg2: memref<32x32xbf16, #tpu.memory_space<vmem>>, %arg3: memref<128x8xbf16, #tpu.memory_space<vmem>>, %arg4: memref<1x8xf32, #tpu.memory_space<vmem>>, %arg5: memref<48x16xbf16, #tpu.memory_space<vmem>>, %arg6: memref<1x16xf32, #tpu.memory_space<vmem>>, %arg7: memref<128x128xbf16, #tpu.memory_space<vmem>>, %arg8: memref<1x128xf32, #tpu.memory_space<vmem>>, %arg9: memref<1x1x128xf32, #tpu.memory_space<vmem>>) attributes {dimension_semantics = [#tpu.dimension_semantics<parallel>], iteration_bounds = array<i64: 2>, scalar_prefetch = 0 : i64, scratch_operands = 0 : i64, tpu.core_type = #tpu.core_type<tc>, window_params = [{transform_indices = @transform_0, window_bounds = array<i64: 32, 1>}, {pipeline_mode = #tpu.pipeline_mode<synchronous>, transform_indices = @transform_1, window_bounds = array<i64: 32, 32>}, {pipeline_mode = #tpu.pipeline_mode<synchronous>, transform_indices = @transform_2, window_bounds = array<i64: 128, 8>}, {pipeline_mode = #tpu.pipeline_mode<synchronous>, transform_indices = @transform_3, window_bounds = array<i64: 1, 8>}, {pipeline_mode = #tpu.pipeline_mode<synchronous>, transform_indices = @transform_4, window_bounds = array<i64: 48, 16>}, {pipeline_mode = #tpu.pipeline_mode<synchronous>, transform_indices = @transform_5, window_bounds = array<i64: 1, 16>}, {pipeline_mode = #tpu.pipeline_mode<synchronous>, transform_indices = @transform_6, window_bounds = array<i64: 128, 128>}, {pipeline_mode = #tpu.pipeline_mode<synchronous>, transform_indices = @transform_7, window_bounds = array<i64: 1, 128>}, {transform_indices = @transform_8, window_bounds = array<i64: 1, 1, 128>}]} {
    %c0 = arith.constant 0 : index
    %c0_0 = arith.constant 0 : index
    %0 = vector.load %arg1[%c0, %c0_0] : memref<32x1xi32, #tpu.memory_space<vmem>>, vector<32x1xi32>
    %1 = tpu.iota {dimensions = array<i32: 1>} : vector<32x32xi32>
    %2 = vector.broadcast %0 : vector<32x1xi32> to vector<32x32xi32>
    %3 = arith.cmpi eq, %2, %1 : vector<32x32xi32>
    %4 = arith.extui %3 : vector<32x32xi1> to vector<32x32xi32>
    %5 = arith.sitofp %4 : vector<32x32xi32> to vector<32x32xf32>
    %6 = arith.truncf %5 : vector<32x32xf32> to vector<32x32xbf16>
    %c0_1 = arith.constant 0 : index
    %c0_2 = arith.constant 0 : index
    %7 = vector.load %arg2[%c0_1, %c0_2] : memref<32x32xbf16, #tpu.memory_space<vmem>>, vector<32x32xbf16>
    %cst = arith.constant dense<0.000000e+00> : vector<32x32xf32>
    %8 = tpu.matmul %6, %7, %cst {dimension_numbers = #tpu.dot_dimension_numbers<[1], [0], [0], [1], [0, 0, 1, 1], [], []>} : vector<32x32xbf16>, vector<32x32xbf16>, vector<32x32xf32> -> vector<32x32xf32>
    %9 = arith.truncf %8 : vector<32x32xf32> to vector<32x32xbf16>
    %cst_3 = arith.constant 0.000000e+00 : bf16
    %10 = vector.broadcast %cst_3 : bf16 to vector<8x32xbf16>
    %11 = tpu.concatenate %9, %10 in 0 : vector<32x32xbf16>, vector<8x32xbf16> -> vector<40x32xbf16>
    %c0_4 = arith.constant 0 : index
    %c0_5 = arith.constant 0 : index
    %12 = vector.load %arg3[%c0_4, %c0_5] : memref<128x8xbf16, #tpu.memory_space<vmem>>, vector<32x8xbf16>
    %cst_6 = arith.constant dense<0.000000e+00> : vector<32x8xf32>
    %13 = tpu.matmul %9, %12, %cst_6 {dimension_numbers = #tpu.dot_dimension_numbers<[1], [0], [0], [1], [0, 0, 1, 1], [], []>} : vector<32x32xbf16>, vector<32x8xbf16>, vector<32x8xf32> -> vector<32x8xf32>
    %14 = vector.extract_strided_slice %11 {offsets = [1, 0], sizes = [32, 32], strides = [1, 1]} : vector<40x32xbf16> to vector<32x32xbf16>
    %c32 = arith.constant 32 : index
    %c0_7 = arith.constant 0 : index
    %15 = vector.load %arg3[%c32, %c0_7] : memref<128x8xbf16, #tpu.memory_space<vmem>>, vector<32x8xbf16>
    %cst_8 = arith.constant dense<0.000000e+00> : vector<32x8xf32>
    %16 = tpu.matmul %14, %15, %cst_8 {dimension_numbers = #tpu.dot_dimension_numbers<[1], [0], [0], [1], [0, 0, 1, 1], [], []>} : vector<32x32xbf16>, vector<32x8xbf16>, vector<32x8xf32> -> vector<32x8xf32>
    %17 = arith.addf %13, %16 : vector<32x8xf32>
    %18 = vector.extract_strided_slice %11 {offsets = [2, 0], sizes = [32, 32], strides = [1, 1]} : vector<40x32xbf16> to vector<32x32xbf16>
    %c64 = arith.constant 64 : index
    %c0_9 = arith.constant 0 : index
    %19 = vector.load %arg3[%c64, %c0_9] : memref<128x8xbf16, #tpu.memory_space<vmem>>, vector<32x8xbf16>
    %cst_10 = arith.constant dense<0.000000e+00> : vector<32x8xf32>
    %20 = tpu.matmul %18, %19, %cst_10 {dimension_numbers = #tpu.dot_dimension_numbers<[1], [0], [0], [1], [0, 0, 1, 1], [], []>} : vector<32x32xbf16>, vector<32x8xbf16>, vector<32x8xf32> -> vector<32x8xf32>
    %21 = arith.addf %17, %20 : vector<32x8xf32>
    %22 = vector.extract_strided_slice %11 {offsets = [3, 0], sizes = [32, 32], strides = [1, 1]} : vector<40x32xbf16> to vector<32x32xbf16>
    %c96 = arith.constant 96 : index
    %c0_11 = arith.constant 0 : index
    %23 = vector.load %arg3[%c96, %c0_11] : memref<128x8xbf16, #tpu.memory_space<vmem>>, vector<32x8xbf16>
    %cst_12 = arith.constant dense<0.000000e+00> : vector<32x8xf32>
    %24 = tpu.matmul %22, %23, %cst_12 {dimension_numbers = #tpu.dot_dimension_numbers<[1], [0], [0], [1], [0, 0, 1, 1], [], []>} : vector<32x32xbf16>, vector<32x8xbf16>, vector<32x8xf32> -> vector<32x8xf32>
    %25 = arith.addf %21, %24 : vector<32x8xf32>
    %c0_13 = arith.constant 0 : index
    %c0_14 = arith.constant 0 : index
    %26 = vector.load %arg4[%c0_13, %c0_14] : memref<1x8xf32, #tpu.memory_space<vmem>>, vector<1x8xf32>
    %27 = vector.broadcast %26 : vector<1x8xf32> to vector<32x8xf32>
    %28 = arith.addf %25, %27 : vector<32x8xf32>
    %cst_15 = arith.constant 0.000000e+00 : f32
    %29 = vector.broadcast %cst_15 : f32 to vector<32x8xf32>
    %30 = arith.maximumf %28, %29 : vector<32x8xf32>
    %31 = arith.truncf %30 : vector<32x8xf32> to vector<32x8xbf16>
    %cst_16 = arith.constant 0.000000e+00 : bf16
    %32 = vector.broadcast %cst_16 : bf16 to vector<8x8xbf16>
    %33 = tpu.concatenate %31, %32 in 0 : vector<32x8xbf16>, vector<8x8xbf16> -> vector<40x8xbf16>
    %c0_17 = arith.constant 0 : index
    %c0_18 = arith.constant 0 : index
    %34 = vector.load %arg5[%c0_17, %c0_18] : memref<48x16xbf16, #tpu.memory_space<vmem>>, vector<8x16xbf16>
    %cst_19 = arith.constant dense<0.000000e+00> : vector<32x16xf32>
    %35 = tpu.matmul %31, %34, %cst_19 {dimension_numbers = #tpu.dot_dimension_numbers<[1], [0], [0], [1], [0, 0, 1, 1], [], []>} : vector<32x8xbf16>, vector<8x16xbf16>, vector<32x16xf32> -> vector<32x16xf32>
    %36 = vector.extract_strided_slice %33 {offsets = [1, 0], sizes = [32, 8], strides = [1, 1]} : vector<40x8xbf16> to vector<32x8xbf16>
    %c8 = arith.constant 8 : index
    %c0_20 = arith.constant 0 : index
    %37 = vector.load %arg5[%c8, %c0_20] : memref<48x16xbf16, #tpu.memory_space<vmem>>, vector<8x16xbf16>
    %cst_21 = arith.constant dense<0.000000e+00> : vector<32x16xf32>
    %38 = tpu.matmul %36, %37, %cst_21 {dimension_numbers = #tpu.dot_dimension_numbers<[1], [0], [0], [1], [0, 0, 1, 1], [], []>} : vector<32x8xbf16>, vector<8x16xbf16>, vector<32x16xf32> -> vector<32x16xf32>
    %39 = arith.addf %35, %38 : vector<32x16xf32>
    %40 = vector.extract_strided_slice %33 {offsets = [2, 0], sizes = [32, 8], strides = [1, 1]} : vector<40x8xbf16> to vector<32x8xbf16>
    %c16 = arith.constant 16 : index
    %c0_22 = arith.constant 0 : index
    %41 = vector.load %arg5[%c16, %c0_22] : memref<48x16xbf16, #tpu.memory_space<vmem>>, vector<8x16xbf16>
    %cst_23 = arith.constant dense<0.000000e+00> : vector<32x16xf32>
    %42 = tpu.matmul %40, %41, %cst_23 {dimension_numbers = #tpu.dot_dimension_numbers<[1], [0], [0], [1], [0, 0, 1, 1], [], []>} : vector<32x8xbf16>, vector<8x16xbf16>, vector<32x16xf32> -> vector<32x16xf32>
    %43 = arith.addf %39, %42 : vector<32x16xf32>
    %44 = vector.extract_strided_slice %33 {offsets = [3, 0], sizes = [32, 8], strides = [1, 1]} : vector<40x8xbf16> to vector<32x8xbf16>
    %c24 = arith.constant 24 : index
    %c0_24 = arith.constant 0 : index
    %45 = vector.load %arg5[%c24, %c0_24] : memref<48x16xbf16, #tpu.memory_space<vmem>>, vector<8x16xbf16>
    %cst_25 = arith.constant dense<0.000000e+00> : vector<32x16xf32>
    %46 = tpu.matmul %44, %45, %cst_25 {dimension_numbers = #tpu.dot_dimension_numbers<[1], [0], [0], [1], [0, 0, 1, 1], [], []>} : vector<32x8xbf16>, vector<8x16xbf16>, vector<32x16xf32> -> vector<32x16xf32>
    %47 = arith.addf %43, %46 : vector<32x16xf32>
    %48 = vector.extract_strided_slice %33 {offsets = [4, 0], sizes = [32, 8], strides = [1, 1]} : vector<40x8xbf16> to vector<32x8xbf16>
    %c32_26 = arith.constant 32 : index
    %c0_27 = arith.constant 0 : index
    %49 = vector.load %arg5[%c32_26, %c0_27] : memref<48x16xbf16, #tpu.memory_space<vmem>>, vector<8x16xbf16>
    %cst_28 = arith.constant dense<0.000000e+00> : vector<32x16xf32>
    %50 = tpu.matmul %48, %49, %cst_28 {dimension_numbers = #tpu.dot_dimension_numbers<[1], [0], [0], [1], [0, 0, 1, 1], [], []>} : vector<32x8xbf16>, vector<8x16xbf16>, vector<32x16xf32> -> vector<32x16xf32>
    %51 = arith.addf %47, %50 : vector<32x16xf32>
    %52 = vector.extract_strided_slice %33 {offsets = [5, 0], sizes = [32, 8], strides = [1, 1]} : vector<40x8xbf16> to vector<32x8xbf16>
    %c40 = arith.constant 40 : index
    %c0_29 = arith.constant 0 : index
    %53 = vector.load %arg5[%c40, %c0_29] : memref<48x16xbf16, #tpu.memory_space<vmem>>, vector<8x16xbf16>
    %cst_30 = arith.constant dense<0.000000e+00> : vector<32x16xf32>
    %54 = tpu.matmul %52, %53, %cst_30 {dimension_numbers = #tpu.dot_dimension_numbers<[1], [0], [0], [1], [0, 0, 1, 1], [], []>} : vector<32x8xbf16>, vector<8x16xbf16>, vector<32x16xf32> -> vector<32x16xf32>
    %55 = arith.addf %51, %54 : vector<32x16xf32>
    %c0_31 = arith.constant 0 : index
    %c0_32 = arith.constant 0 : index
    %56 = vector.load %arg6[%c0_31, %c0_32] : memref<1x16xf32, #tpu.memory_space<vmem>>, vector<1x16xf32>
    %57 = vector.broadcast %56 : vector<1x16xf32> to vector<32x16xf32>
    %58 = arith.addf %55, %57 : vector<32x16xf32>
    %cst_33 = arith.constant 0.000000e+00 : f32
    %59 = vector.broadcast %cst_33 : f32 to vector<32x16xf32>
    %60 = arith.maximumf %58, %59 : vector<32x16xf32>
    %61 = arith.truncf %60 : vector<32x16xf32> to vector<32x16xbf16>
    %cst_34 = arith.constant 0.000000e+00 : bf16
    %62 = vector.broadcast %cst_34 : bf16 to vector<8x16xbf16>
    %63 = tpu.concatenate %61, %62 in 0 : vector<32x16xbf16>, vector<8x16xbf16> -> vector<40x16xbf16>
    %c0_35 = arith.constant 0 : index
    %c0_36 = arith.constant 0 : index
    %64 = vector.load %arg7[%c0_35, %c0_36] : memref<128x128xbf16, #tpu.memory_space<vmem>>, vector<16x128xbf16>
    %cst_37 = arith.constant dense<0.000000e+00> : vector<32x128xf32>
    %65 = tpu.matmul %61, %64, %cst_37 {dimension_numbers = #tpu.dot_dimension_numbers<[1], [0], [0], [1], [0, 0, 1, 1], [], []>} : vector<32x16xbf16>, vector<16x128xbf16>, vector<32x128xf32> -> vector<32x128xf32>
    %66 = vector.extract_strided_slice %63 {offsets = [1, 0], sizes = [32, 16], strides = [1, 1]} : vector<40x16xbf16> to vector<32x16xbf16>
    %c16_38 = arith.constant 16 : index
    %c0_39 = arith.constant 0 : index
    %67 = vector.load %arg7[%c16_38, %c0_39] : memref<128x128xbf16, #tpu.memory_space<vmem>>, vector<16x128xbf16>
    %cst_40 = arith.constant dense<0.000000e+00> : vector<32x128xf32>
    %68 = tpu.matmul %66, %67, %cst_40 {dimension_numbers = #tpu.dot_dimension_numbers<[1], [0], [0], [1], [0, 0, 1, 1], [], []>} : vector<32x16xbf16>, vector<16x128xbf16>, vector<32x128xf32> -> vector<32x128xf32>
    %69 = arith.addf %65, %68 : vector<32x128xf32>
    %70 = vector.extract_strided_slice %63 {offsets = [2, 0], sizes = [32, 16], strides = [1, 1]} : vector<40x16xbf16> to vector<32x16xbf16>
    %c32_41 = arith.constant 32 : index
    %c0_42 = arith.constant 0 : index
    %71 = vector.load %arg7[%c32_41, %c0_42] : memref<128x128xbf16, #tpu.memory_space<vmem>>, vector<16x128xbf16>
    %cst_43 = arith.constant dense<0.000000e+00> : vector<32x128xf32>
    %72 = tpu.matmul %70, %71, %cst_43 {dimension_numbers = #tpu.dot_dimension_numbers<[1], [0], [0], [1], [0, 0, 1, 1], [], []>} : vector<32x16xbf16>, vector<16x128xbf16>, vector<32x128xf32> -> vector<32x128xf32>
    %73 = arith.addf %69, %72 : vector<32x128xf32>
    %74 = vector.extract_strided_slice %63 {offsets = [3, 0], sizes = [32, 16], strides = [1, 1]} : vector<40x16xbf16> to vector<32x16xbf16>
    %c48 = arith.constant 48 : index
    %c0_44 = arith.constant 0 : index
    %75 = vector.load %arg7[%c48, %c0_44] : memref<128x128xbf16, #tpu.memory_space<vmem>>, vector<16x128xbf16>
    %cst_45 = arith.constant dense<0.000000e+00> : vector<32x128xf32>
    %76 = tpu.matmul %74, %75, %cst_45 {dimension_numbers = #tpu.dot_dimension_numbers<[1], [0], [0], [1], [0, 0, 1, 1], [], []>} : vector<32x16xbf16>, vector<16x128xbf16>, vector<32x128xf32> -> vector<32x128xf32>
    %77 = arith.addf %73, %76 : vector<32x128xf32>
    %78 = vector.extract_strided_slice %63 {offsets = [4, 0], sizes = [32, 16], strides = [1, 1]} : vector<40x16xbf16> to vector<32x16xbf16>
    %c64_46 = arith.constant 64 : index
    %c0_47 = arith.constant 0 : index
    %79 = vector.load %arg7[%c64_46, %c0_47] : memref<128x128xbf16, #tpu.memory_space<vmem>>, vector<16x128xbf16>
    %cst_48 = arith.constant dense<0.000000e+00> : vector<32x128xf32>
    %80 = tpu.matmul %78, %79, %cst_48 {dimension_numbers = #tpu.dot_dimension_numbers<[1], [0], [0], [1], [0, 0, 1, 1], [], []>} : vector<32x16xbf16>, vector<16x128xbf16>, vector<32x128xf32> -> vector<32x128xf32>
    %81 = arith.addf %77, %80 : vector<32x128xf32>
    %82 = vector.extract_strided_slice %63 {offsets = [5, 0], sizes = [32, 16], strides = [1, 1]} : vector<40x16xbf16> to vector<32x16xbf16>
    %c80 = arith.constant 80 : index
    %c0_49 = arith.constant 0 : index
    %83 = vector.load %arg7[%c80, %c0_49] : memref<128x128xbf16, #tpu.memory_space<vmem>>, vector<16x128xbf16>
    %cst_50 = arith.constant dense<0.000000e+00> : vector<32x128xf32>
    %84 = tpu.matmul %82, %83, %cst_50 {dimension_numbers = #tpu.dot_dimension_numbers<[1], [0], [0], [1], [0, 0, 1, 1], [], []>} : vector<32x16xbf16>, vector<16x128xbf16>, vector<32x128xf32> -> vector<32x128xf32>
    %85 = arith.addf %81, %84 : vector<32x128xf32>
    %86 = vector.extract_strided_slice %63 {offsets = [6, 0], sizes = [32, 16], strides = [1, 1]} : vector<40x16xbf16> to vector<32x16xbf16>
    %c96_51 = arith.constant 96 : index
    %c0_52 = arith.constant 0 : index
    %87 = vector.load %arg7[%c96_51, %c0_52] : memref<128x128xbf16, #tpu.memory_space<vmem>>, vector<16x128xbf16>
    %cst_53 = arith.constant dense<0.000000e+00> : vector<32x128xf32>
    %88 = tpu.matmul %86, %87, %cst_53 {dimension_numbers = #tpu.dot_dimension_numbers<[1], [0], [0], [1], [0, 0, 1, 1], [], []>} : vector<32x16xbf16>, vector<16x128xbf16>, vector<32x128xf32> -> vector<32x128xf32>
    %89 = arith.addf %85, %88 : vector<32x128xf32>
    %90 = vector.extract_strided_slice %63 {offsets = [7, 0], sizes = [32, 16], strides = [1, 1]} : vector<40x16xbf16> to vector<32x16xbf16>
    %c112 = arith.constant 112 : index
    %c0_54 = arith.constant 0 : index
    %91 = vector.load %arg7[%c112, %c0_54] : memref<128x128xbf16, #tpu.memory_space<vmem>>, vector<16x128xbf16>
    %cst_55 = arith.constant dense<0.000000e+00> : vector<32x128xf32>
    %92 = tpu.matmul %90, %91, %cst_55 {dimension_numbers = #tpu.dot_dimension_numbers<[1], [0], [0], [1], [0, 0, 1, 1], [], []>} : vector<32x16xbf16>, vector<16x128xbf16>, vector<32x128xf32> -> vector<32x128xf32>
    %93 = arith.addf %89, %92 : vector<32x128xf32>
    %c0_56 = arith.constant 0 : index
    %c0_57 = arith.constant 0 : index
    %94 = vector.load %arg8[%c0_56, %c0_57] : memref<1x128xf32, #tpu.memory_space<vmem>>, vector<1x128xf32>
    %95 = vector.broadcast %94 : vector<1x128xf32> to vector<32x128xf32>
    %96 = arith.addf %93, %95 : vector<32x128xf32>
    %cst_58 = arith.constant 0.000000e+00 : f32
    %97 = vector.broadcast %cst_58 : f32 to vector<32x128xf32>
    %98 = arith.maximumf %96, %97 : vector<32x128xf32>
    %99 = vector.shape_cast %98 : vector<32x128xf32> to vector<1x32x128xf32>
    %100 = tpu.iota {dimensions = array<i32: 1>} : vector<1x32x128xi32>
    %c17_i32 = arith.constant 17 : i32
    %101 = vector.broadcast %c17_i32 : i32 to vector<1x32x128xi32>
    %102 = arith.cmpi slt, %100, %101 : vector<1x32x128xi32>
    %cst_59 = arith.constant 0.000000e+00 : f32
    %103 = vector.broadcast %cst_59 : f32 to vector<1x32x128xf32>
    %104 = arith.select %102, %99, %103 : vector<1x32x128xi1>, vector<1x32x128xf32>
    %cst_60 = arith.constant dense<0xFF800000> : vector<1x128xf32>
    %105 = vector.multi_reduction <maximumf>, %104, %cst_60 [1] : vector<1x32x128xf32> to vector<1x128xf32>
    %106 = vector.shape_cast %105 : vector<1x128xf32> to vector<1x1x128xf32>
    %c0_61 = arith.constant 0 : index
    %c0_62 = arith.constant 0 : index
    %c0_63 = arith.constant 0 : index
    %107 = vector.load %arg9[%c0_61, %c0_62, %c0_63] : memref<1x1x128xf32, #tpu.memory_space<vmem>>, vector<1x1x128xf32>
    tpu.vector_store %arg9[%c0_61, %c0_62, %c0_63], %106 {strides = array<i32>} : memref<1x1x128xf32, #tpu.memory_space<vmem>>, vector<1x1x128xf32>,
    return
  }
  func.func @transform_0(%arg0: i32) -> (i32, i32) {
    %c0_i32 = arith.constant 0 : i32
    %c0_i32_0 = arith.constant 0 : i32
    return %arg0, %c0_i32 : i32, i32
  }
  func.func @transform_1(%arg0: i32) -> (i32, i32) {
    %c0_i32 = arith.constant 0 : i32
    %c0_i32_0 = arith.constant 0 : i32
    %c0_i32_1 = arith.constant 0 : i32
    return %c0_i32, %c0_i32_0 : i32, i32
  }
  func.func @transform_2(%arg0: i32) -> (i32, i32) {
    %c0_i32 = arith.constant 0 : i32
    %c0_i32_0 = arith.constant 0 : i32
    %c0_i32_1 = arith.constant 0 : i32
    return %c0_i32, %c0_i32_0 : i32, i32
  }
  func.func @transform_3(%arg0: i32) -> (i32, i32) {
    %c0_i32 = arith.constant 0 : i32
    %c0_i32_0 = arith.constant 0 : i32
    %c0_i32_1 = arith.constant 0 : i32
    return %c0_i32, %c0_i32_0 : i32, i32
  }
  func.func @transform_4(%arg0: i32) -> (i32, i32) {
    %c0_i32 = arith.constant 0 : i32
    %c0_i32_0 = arith.constant 0 : i32
    %c0_i32_1 = arith.constant 0 : i32
    return %c0_i32, %c0_i32_0 : i32, i32
  }
  func.func @transform_5(%arg0: i32) -> (i32, i32) {
    %c0_i32 = arith.constant 0 : i32
    %c0_i32_0 = arith.constant 0 : i32
    %c0_i32_1 = arith.constant 0 : i32
    return %c0_i32, %c0_i32_0 : i32, i32
  }
  func.func @transform_6(%arg0: i32) -> (i32, i32) {
    %c0_i32 = arith.constant 0 : i32
    %c0_i32_0 = arith.constant 0 : i32
    %c0_i32_1 = arith.constant 0 : i32
    return %c0_i32, %c0_i32_0 : i32, i32
  }
  func.func @transform_7(%arg0: i32) -> (i32, i32) {
    %c0_i32 = arith.constant 0 : i32
    %c0_i32_0 = arith.constant 0 : i32
    %c0_i32_1 = arith.constant 0 : i32
    return %c0_i32, %c0_i32_0 : i32, i32
  }
  func.func @transform_8(%arg0: i32) -> (i32, i32, i32) {
    %c0_i32 = arith.constant 0 : i32
    %c0_i32_0 = arith.constant 0 : i32
    %c0_i32_1 = arith.constant 0 : i32
    return %arg0, %c0_i32, %c0_i32_0 : i32, i32, i32
  }
}

</mosaic_0001>

<bundles_post_ra>
// kernel: tpu_custom_call.1
= control target key start
LH: loop header
LB: loop body
LE: loop exit
PB: predicated region body
PF: predicated region fallthrough
CT: control target
= control target key end

     0   :  { %13 = vsyncpa [#allocation3], 0  ;;  %s2688_s0 = inlined_call_operand.vmem [shape: s32[64,1], index: 0, kind: input, shape index: {}]   ;;  %s2689_s1 = inlined_call_operand.vmem [shape: bf16[32,32], index: 1, kind: input, shape index: {}]   ;;  %s2690_s2 = inlined_call_operand.vmem [shape: bf16[128,8], index: 2, kind: input, shape index: {}]   ;;  %s2691_s3 = inlined_call_operand.vmem [shape: f32[1,8], index: 3, kind: input, shape index: {}]   ;;  %s2692_s4 = inlined_call_operand.vmem [shape: bf16[48,16], index: 4, kind: input, shape index: {}]   ;;  %s2693_s5 = inlined_call_operand.vmem [shape: f32[1,16], index: 5, kind: input, shape index: {}]   ;;  %s2694_s6 = inlined_call_operand.vmem [shape: bf16[128,128], index: 6, kind: input, shape index: {}]   ;;  %s2695_s7 = inlined_call_operand.vmem [shape: f32[1,128], index: 7, kind: input, shape index: {}]   ;;  %s2696_s8 = inlined_call_operand.hbm [shape: f32[2,1,128], index: 8, kind: output, shape index: {}]  }
   0x1   :  { %15 = vsyncpa [#allocation3 + $0x1], 0  ;;  %s2360_s27 = smov 0   ;;  %s2362_s28 = smov 0  }
   0x2   :  { %s2364_s29 = smov 0   ;;  %s2366_s30 = smov 0  }
   0x3 LB: > { %s2381_s9 = sadd.s32 4294967295, %s2310_s30   ;;  %s1891_s10 = sadd.s32 4294967294, %s2310_s30   ;;  %s2310_s30 = sphi %s2366_s30, %s2702_s30   ;;  %s2306_s29 = sphi %s2364_s29, %s2701_s29   ;;  %s2302_s28 = sphi %s2362_s28, %s2700_s28   ;;  %s2298_s27 = sphi %s2360_s27, %s2699_s27  }
   0x4   : > { %s2385_s11 = sadd.s32 1, %s2310_s30   ;;  %s201_s12 = sadd.s32 1, %s2306_s29 }
   0x5   : > { %s198_s13 = ssub.s32 %s2310_s30, %s2385_s11  ;;  %p211_p0 = scmp.ne.s32.totalorder %s2306_s29, %s2302_s28 }
   0x6   : > { %p199_p1 = scmp.eq.s32.totalorder %s198_s13, 0  ;;  %p212_p2 = scmp.eq.s32.totalorder %s2381_s9, 1 }
   0x7   : > { %p217_p3 = scmp.ne.s32.totalorder %s2302_s28, %s2298_s27  ;;  %p218_p4 = scmp.eq.s32.totalorder %s1891_s10, 1 }
   0x8   : > { %s2396_s14 = scalar_select %p199_p1, %s2306_s29, %s201_s12  }
   0x9   : > { %p2398_p5 = por %p212_p2, %p211_p0  ;;  %p2402_p6 = por %p218_p4, %p217_p3 }
   0xa   : > { %p1894_p7 = scmp.ge.s32.totalorder %s2310_s30, 1  ;;  %p266_p8 = scmp.lt.s32.totalorder %s2310_s30, 3 }
   0xc   : > { %p267_p9 = pnand %p1894_p7, %p266_p8 }
   0xd   : > { %s1895_s17 = sshll.u32 (!%p267_p9), %s2381_s9, 2  ;;  %v2312_v0 = vmov (!%p267_p9), 0   ;;  %v2230_v5 = vld [vmem:[%s2689_s1] sm:$0xff] (!%p267_p9)   ;;  %v2231_v6 = vld [vmem:[%s2689_s1 + $0x8] sm:$0xff] (!%p267_p9)   ;;  %v310_v7 = vlaneseq (!%p267_p9)  ;;  %vm354_vm4 = vcmask (!%p267_p9), 261120   ;;  %v2313_v13 = vmov (!%p267_p9), 0.0  }
   0xe   : > { %270 = sbr.rel (%p267_p9) target bundleno = 1226 (0x4ca), region = 52  ;;  %2229 = vset.pattern.permute.xlu1 (!%p267_p9), %v2312_v0  ;;  %2228 = vset.pattern.permute.xlu0 (!%p267_p9), %v2312_v0  ;;  %p300_p10 = scmp.lt.s32.totalorder (!%p267_p9), %s1895_s17, 7  ;;  %v2232_v20 = vld [vmem:[%s2690_s2 + $0x10] sm:$0xff] (!%p267_p9)   ;;  %v2233_v21 = vld [vmem:[%s2690_s2 + $0x18] sm:$0xff] (!%p267_p9)   ;;  %v2234_v22 = vld [vmem:[%s2690_s2] sm:$0xff] (!%p267_p9)   ;;  %vm580_vm5 = vcmask (!%p267_p9), 1046528  }
   0xf   : > { %2025 = vmatprep.subr.bf16.mxu0 (!%p267_p9), %v2230_v5  ;;  %v311_v8 = vand.u32 (!%p267_p9), 127, %v310_v7  ;;  %2033 = vmatprep.subr.bf16.mxu1 (!%p267_p9), %v2232_v20  ;;  %vm420_vm6 = vsmask.f32 (!%p267_p9), 7424  ;;  %vm661_vm7 = vsmask.f32 (!%p267_p9), 6400  ;;  %v2434_v46 = vrot.slane (!%p267_p9), %v2312_v0, 1 }
  0x10   : > { %2026 = vmatpush3.bf16.msra.mxu0 (!%p267_p9), %v2230_v5  ;;  %2034 = vmatpush3.bf16.msra.mxu1 (!%p267_p9), %v2232_v20  ;;  %v2235_v48 = vld [vmem:[%s2690_s2 + $0x8] sm:$0xff] (!%p267_p9)   ;;  %v2236_v51 = vld [vmem:[%s2690_s2 + $0x20] sm:$0xff] (!%p267_p9)   ;;  %v2238_v53 = vld [vmem:[%s2690_s2 + $0x30] sm:$0xff] (!%p267_p9)   ;;  %v2465_v56 = vrot.slane (!%p267_p9), %v2312_v0, 2  ;;  %vm788_vm8 = vcmask (!%p267_p9), 1043456   ;;  %vm1038_vm9 = vcmask (!%p267_p9), 1045504  }
  0x11   : > { %2027 = vmatprep.subr.bf16.mxu0 (!%p267_p9), %v2231_v6  ;;  %2035 = vmatprep.subr.bf16.mxu1 (!%p267_p9), %v2233_v21  ;;  %v2237_v52 = vld [vmem:[%s2690_s2 + $0x28] sm:$0xff] (!%p267_p9)   ;;  %v2239_v54 = vld [vmem:[%s2690_s2 + $0x38] sm:$0xff] (!%p267_p9)   ;;  %v764_v59 = vld [vmem:[%s2692_s4 + $0x4] sm:$0xf] (!%p267_p9)  ;;  %vm781_vm10 = vcmask (!%p267_p9), 64512   ;;  %vm1224_vm12 = vcmask (!%p267_p9), 130048  }
  0x12   : > { %v2469_v57 = vor.u32 (!%p267_p9), %v2465_v56, %v2434_v46  ;;  %v790_v60 = vsel (!%p267_p9), %vm788_vm8, %v764_v59, 0  ;;  %v763_v61 = vld [vmem:[%s2692_s4] sm:$0xf] (!%p267_p9)  ;;  %vm1107_vm11 = vsmask.f32 (!%p267_p9), 5376  ;;  %vm1635_vm13 = vcmask (!%p267_p9), 1044480  }
  0x13   : > { %v1921_v62 = vld [vmem:[%s2691_s3] ss:$0 sm:$0xff] (!%p267_p9)  ;;  %vm1708_vm14 = vsmask.f32 (!%p267_p9), 4352  ;;  %s297_s24 = sand.u32 (!%p267_p9), 1, %s2302_s28   ;;  %s1960_s25 = sshll.u32 (!%p267_p9), %s2381_s9, 4 }
  0x14   : > { %2028 = vmatpush3.bf16.msra.mxu0 (!%p267_p9), %v2231_v6  ;;  %2036 = vmatpush3.bf16.msra.mxu1 (!%p267_p9), %v2233_v21  ;;  %s298_s26 = scalar_lea.vmem (!%p267_p9), [#allocation2], %s297_s24  ;;  %s2314_s9 = smov (!%p267_p9), [#allocation2]  }
  0x15   : > { %s2704_s17 = smov (!%p300_p10, %s1895_s17), 7  ;;  %2041 = vmatprep.subr.bf16.mxu1 %v2234_v22  ;;  %2181 = vmatprep.subr.msk.bf16.mxu0 %vm788_vm8, %v764_v59  ;;  %s1836_s10 = sshll.u32 %s298_s26, 4  ;;  %s2648_s10 = int_to_ptr.vmem [resolvable:$true] %s1836_s10 }
  0x16   : > { %s1896_s18 = sshll.u32 %s2704_s17, 3  ;;  %s2646_s17 = scalar_lea.hbm %s2696_s8, %s1960_s25 }
  0x17   : > { %s303_s21 = scalar_lea.vmem %s2688_s0, %s1896_s18  ;;  %s1824_s18 = scalar_lea.sflag [#allocation3], %s297_s24 }
  0x18   : > { %v308_v1 = vld [vmem:[%s303_s21 + $0x10] sm:$0xff]  ;;  %v306_v2 = vld [vmem:[%s303_s21] sm:$0xff]  ;;  %v309_v3 = vld [vmem:[%s303_s21 + $0x18] sm:$0xff]  ;;  %s2248_s19 = scalar_lea.vmem %s2648_s10, 16  ;;  %s2252_s20 = sshll.u32 %s2314_s9, 4  ;;  %s2253_s20 = int_to_ptr.vmem [resolvable:$false] %s2252_s20 }
  0x19   : > { %319 = vperm.xlu1 %2229, %v308_v1   ;;  %313 = vperm.xlu0 %2228, %v306_v2   ;;  %v307_v4 = vld [vmem:[%s303_s21 + $0x8] sm:$0xff]  ;;  %p2249_p11 = scmp.ne.s32.totalorder %s2648_s10, %s2248_s19  ;;  %s2254_s21 = scalar_lea.vmem %s2253_s20, 32 }
  0x1a   : > { %p2255_p0 = scmp.lt.s32.totalorder %s2648_s10, %s2253_s20  ;;  %p2256_p1 = scmp.lt.s32.totalorder %s2254_s21, %s2248_s19 }
  0x1b   : > { %p2250_p12 = pnand %p2249_p11, %p2398_p5 }
  0x1c   : > { %p2257_p2 = por %p2256_p1, %p2255_p0 }
  0x1d   : > { %322 = vperm.xlu1 %2229, %v309_v3   ;;  %316 = vperm.xlu0 %2228, %v307_v4   ;;  %p2251_p13 = pneg %p2250_p12 }
  0x1f   : > { %p2258_p3 = pnand %p2257_p2, %p2251_p13 }
  0x98   : > { %v320_v9 = vpop.permute.xlu1 %319  ;;  %v314_v10 = vpop.permute.xlu0 %313 }
  0x99   : > { %vm326_vm0 = vcmp.eq.s32.totalorder %v320_v9, %v311_v8  ;;  %vm324_vm1 = vcmp.eq.s32.totalorder %v314_v10, %v311_v8 }
  0x9a   : > { %v1899_v14 = vsel %vm326_vm0, 1.0, %v2313_v13  ;;  %v1897_v15 = vsel %vm324_vm1, 1.0, %v2313_v13 }
  0x9c   : > { %v323_v11 = vpop.permute.xlu1 %322  ;;  %v317_v12 = vpop.permute.xlu0 %316 }
  0x9d   : > { %vm327_vm2 = vcmp.eq.s32.totalorder %v323_v11, %v311_v8  ;;  %vm325_vm3 = vcmp.eq.s32.totalorder %v317_v12, %v311_v8 }
  0x9e   : > { %v1900_v16 = vsel %vm327_vm2, 1.0, %v2313_v13  ;;  %v1898_v17 = vsel %vm325_vm3, 1.0, %v2313_v13 }
  0x9f   : > { %v337_v18 = vpack.c.bf16 %v1900_v16, %v1899_v14  ;;  %v336_v19 = vpack.c.bf16 %v1898_v17, %v1897_v15 }
  0xa1   : > { %2029 = vmatprep.mubr.msk.bf16.mxu0 %vm354_vm4, %v336_v19 }
  0xa2   : > { %2030 = vmatmul.mubr.msk.bf16.vlgmr.msra.gmra.mrb[0].mxu0 %vm354_vm4, %v337_v18 }
  0xa3   : > { %2066 = vmatpush3.bf16.msra.mxu0 %v790_v60  ;;  %v2539_v60 = vrot.slane %v2312_v0, 3 }
  0xa4   : > { %2182 = vmatprep.subr.msk.bf16.mxu0 %vm788_vm8, %v763_v61 }
 0x175   : > { %v2031_v23 = vpop.f32.mrb[0].mxu0 }
 0x176   : > { %v395_v24 = vpop.f32.mrb[1].mxu0 }
 0x177   : > { %v2032_v25 = vpop.f32.mrb[2].mxu0 }
 0x178   : > { %v411_v26 = vpack.c.bf16 %v2032_v25, %v2031_v23  ;;  %v398_v27 = vpop.f32.mrb[3].mxu0 }
 0x179   : > { %v410_v28 = vpack.c.bf16 %v398_v27, %v395_v24 }
 0x17a   : > { %v433_v29 = vshrl.u32 %v411_v26, 16  ;;  %v429_v30 = vshll.u32 %v411_v26, 16  ;;  %v582_v31 = vrot.slane %v411_v26, 1 }
 0x17b   : > { %v424_v32 = vshll.u32 %v410_v28, 16  ;;  %v422_v33 = vshrl.u32 %v410_v28, 16  ;;  %v581_v34 = vrot.slane %v410_v28, 1 }
 0x17c   : > { %v431_v35 = vrot.slane %v429_v30, 1  ;;  %v666_v36 = vrot.slane %v429_v30, 2  ;;  %v665_v37 = vrot.slane %v433_v29, 1  ;;  %v585_v55 = vsel %vm580_vm5, %v582_v31, %v2434_v46 }
 0x17d   : > { %v426_v38 = vrot.slane %v424_v32, 1  ;;  %v662_v39 = vrot.slane %v422_v33, 1  ;;  %v583_v40 = vsel %vm580_vm5, %v581_v34, %v582_v31  ;;  %v663_v41 = vrot.slane %v424_v32, 2 }
 0x17e   : > { %v435_v42 = vor.u32 %v433_v29, %v431_v35  ;;  %v667_v43 = vor.u32 %v666_v36, %v665_v37 }
 0x17f   : > { %v427_v44 = vor.u32 %v426_v38, %v422_v33  ;;  %v664_v45 = vor.u32 %v663_v41, %v662_v39 }
 0x180   : > { %v440_v50 = vsel %vm420_vm6, %v435_v42, %v2434_v46  ;;  %v674_v58 = vsel %vm661_vm7, %v667_v43, %v2469_v57 }
 0x181   : > { %v432_v47 = vsel %vm420_vm6, %v427_v44, %v431_v35  ;;  %v668_v49 = vsel %vm661_vm7, %v664_v45, %v667_v43  ;;  %v897_v44 = vld [vmem:[%s2692_s4 + $0x8] sm:$0xf] }
 0x182   : > { %2037 = vmatprep.mubr.msk.bf16.mxu1 %vm354_vm4, %v432_v47 }
 0x183   : > { %2038 = vmatmul.mubr.msk.bf16.vlgmr.msra.gmra.mrb[0].mxu1 %vm354_vm4, %v440_v50 }
 0x184   : > { %2042 = vmatpush3.bf16.msra.mxu1 %v2234_v22  ;;  %2045 = vmatprep.mubr.msk.bf16.mxu1 %vm354_vm4, %v410_v28 }
 0x185   : > { %2043 = vmatprep.subr.bf16.mxu1 %v2235_v48 }
 0x188   : > { %2044 = vmatpush3.bf16.msra.mxu1 %v2235_v48  ;;  %v911_v48 = vsel %vm788_vm8, %v897_v44, 0 }
 0x189   : > { %2049 = vmatprep.subr.bf16.mxu1 %v2236_v51 }
 0x18f   : > { %2046 = vmatmul.mubr.msk.bf16.vlgmr.msra.gmra.mrb[0].mxu1 %vm354_vm4, %v411_v26 }
 0x190   : > { %2050 = vmatpush3.bf16.msra.mxu1 %v2236_v51  ;;  %2053 = vmatprep.mubr.msk.bf16.mxu1 %vm354_vm4, %v583_v40  ;;  %v846_v40 = vsel %vm788_vm8, %v763_v61, 0  ;;  %v2543_v61 = vor.u32 %v2539_v60, %v2465_v56 }
 0x191   : > { %2051 = vmatprep.subr.bf16.mxu1 %v2237_v52 }
 0x194   : > { %2052 = vmatpush3.bf16.msra.mxu1 %v2237_v52  ;;  %v1037_v52 = vld [vmem:[%s2692_s4 + $0x10] sm:$0xf] }
 0x195   : > { %2057 = vmatprep.subr.bf16.mxu1 %v2238_v53 }
 0x19b   : > { %2054 = vmatmul.mubr.msk.bf16.vlgmr.msra.gmra.mrb[0].mxu1 %vm354_vm4, %v585_v55  ;;  %v1106_v55 = vld [vmem:[%s2692_s4 + $0x14] sm:$0xf] }
 0x19c   : > { %2058 = vmatpush3.bf16.msra.mxu1 %v2238_v53  ;;  %2061 = vmatprep.mubr.msk.bf16.mxu1 %vm354_vm4, %v668_v49  ;;  %v966_v49 = vld [vmem:[%s2692_s4 + $0xc] sm:$0xf]  ;;  %v1051_v53 = vsel %vm788_vm8, %v1037_v52, 0 }
 0x19d   : > { %2059 = vmatprep.subr.bf16.mxu1 %v2239_v54  ;;  %v982_v50 = vsel %vm788_vm8, %v966_v49, 0 }
 0x1a0   : > { %2060 = vmatpush3.bf16.msra.mxu1 %v2239_v54 }
 0x1a7   : > { %2062 = vmatmul.mubr.msk.bf16.vlgmr.msra.gmra.mrb[0].mxu1 %vm354_vm4, %v674_v58  ;;  %v1126_v58 = vsel %vm788_vm8, %v1106_v55, 0 }
 0x27a   : > { %v2063_v63 = vpop.f32.mrb[0].mxu1 }
 0x27b   : > { %v755_v1 = vadd.f32 %v2063_v63, %v1921_v62  ;;  %v727_v2 = vpop.f32.mrb[1].mxu1  ;;  %v2240_v63 = vld [vmem:[%s2694_s6 + $0x8] sm:$0xff]  }
 0x27c   : > { %v753_v3 = vadd.f32 %v1921_v62, %v727_v2  ;;  %v2064_v4 = vpop.f32.mrb[2].mxu1  ;;  %2101 = vmatprep.subr.bf16.mxu1 %v2240_v63  ;;  %v2557_v2 = vld [vmem:[%s2694_s6] sm:$0xff]  }
 0x27d   : > { %v756_v5 = vadd.f32 %v2064_v4, %v1921_v62  ;;  %v730_v6 = vpop.f32.mrb[3].mxu1  ;;  %v759_v9 = vmax.f32 %v755_v1, 0.0  ;;  %v2241_v1 = vld [vmem:[%s2694_s6 + $0x18] sm:$0xff]   ;;  %2102 = vmatpush3.bf16.msra.mxu1 %v2240_v63  ;;  %v1934_v4 = vld [vmem:[%s2693_s5] ss:$0 sm:$0xff] }
 0x27e   : > { %v754_v8 = vadd.f32 %v1921_v62, %v730_v6  ;;  %v757_v11 = vmax.f32 %v753_v3, 0.0  ;;  %2107 = vmatprep.subr.bf16.mxu1 %v2557_v2  ;;  %v2563_v3 = vld [vmem:[%s2694_s6 + $0x28] sm:$0xff]  }
 0x27f   : > { %v760_v10 = vmax.f32 %v756_v5, 0.0 }
 0x280   : > { %v758_v12 = vmax.f32 %v754_v8, 0.0 }
 0x281   : > { %v2486_v13 = vpack.c.bf16 %v760_v10, %v759_v9 }
 0x282   : > { %v761_v14 = vpack.c.bf16 %v758_v12, %v757_v11 }
 0x283   : > { %v773_v15 = vshll.u32 %v2486_v13, 16  ;;  %v777_v16 = vshrl.u32 %v2486_v13, 16  ;;  %v901_v17 = vrot.slane %v2486_v13, 1  ;;  %v1040_v18 = vrot.slane %v2486_v13, 2 }
 0x284   : > { %v766_v19 = vshrl.u32 %v761_v14, 16  ;;  %v768_v20 = vshll.u32 %v761_v14, 16  ;;  %v900_v21 = vrot.slane %v761_v14, 1  ;;  %v1039_v22 = vrot.slane %v761_v14, 2 }
 0x285   : > { %v775_v23 = vrot.slane %v773_v15, 1  ;;  %v970_v24 = vrot.slane %v777_v16, 1  ;;  %v971_v25 = vrot.slane %v773_v15, 2  ;;  %v1111_v37 = vrot.slane %v777_v16, 2 }
 0x286   : > { %v770_v26 = vrot.slane %v768_v20, 1  ;;  %v902_v27 = vsel %vm580_vm5, %v900_v21, %v901_v17  ;;  %v967_v28 = vrot.slane %v766_v19, 1  ;;  %v968_v29 = vrot.slane %v768_v20, 2 }
 0x287   : > { %v779_v30 = vor.u32 %v777_v16, %v775_v23  ;;  %v972_v31 = vor.u32 %v971_v25, %v970_v24  ;;  %v1041_v32 = vsel %vm1038_vm9, %v1039_v22, %v1040_v18  ;;  %v1108_v35 = vrot.slane %v766_v19, 2 }
 0x288   : > { %v771_v33 = vor.u32 %v770_v26, %v766_v19  ;;  %v969_v34 = vor.u32 %v968_v29, %v967_v28  ;;  %v1109_v36 = vrot.slane %v768_v20, 3  ;;  %v1112_v38 = vrot.slane %v773_v15, 3 }
 0x289   : > { %v780_v43 = vsel %vm420_vm6, %v779_v30, %v2434_v46  ;;  %v903_v51 = vsel %vm580_vm5, %v901_v17, %v2434_v46  ;;  %v974_v54 = vsel %vm661_vm7, %v972_v31, %v2469_v57  ;;  %v1043_v59 = vsel %vm1038_vm9, %v1040_v18, %v2465_v56 }
 0x28a   : > { %v776_v39 = vsel %vm420_vm6, %v771_v33, %v775_v23  ;;  %v973_v41 = vsel %vm661_vm7, %v969_v34, %v972_v31  ;;  %v1110_v42 = vor.u32 %v1109_v36, %v1108_v35  ;;  %v1113_v45 = vor.u32 %v1112_v38, %v1111_v37 }
 0x28b   : > { %2067 = vmatprep.mubr.msk.bf16.mxu0 %vm781_vm10, %v776_v39 }
 0x28c   : > { %2068 = vmatmul.mubr.msk.bf16.vlgmr.msra.gmra.mrb[4].mxu0 %vm781_vm10, %v780_v43  ;;  %v1114_v47 = vsel %vm1107_vm11, %v1110_v42, %v1113_v45  ;;  %v1118_v62 = vsel %vm1107_vm11, %v1113_v45, %v2543_v61 }
 0x28d   : > { %2072 = vmatpush3.bf16.msra.mxu0 %v846_v40  ;;  %2073 = vmatprep.mubr.msk.bf16.mxu0 %vm781_vm10, %v761_v14 }
 0x28e   : > { %2183 = vmatprep.subr.msk.bf16.mxu0 %vm788_vm8, %v897_v44 }
 0x298   : > { %2074 = vmatmul.mubr.msk.bf16.vlgmr.msra.gmra.mrb[4].mxu0 %vm781_vm10, %v2486_v13 }
 0x299   : > { %2078 = vmatpush3.bf16.msra.mxu0 %v911_v48  ;;  %2079 = vmatprep.mubr.msk.bf16.mxu0 %vm781_vm10, %v902_v27 }
 0x29a   : > { %2184 = vmatprep.subr.msk.bf16.mxu0 %vm788_vm8, %v966_v49 }
 0x2a4   : > { %2080 = vmatmul.mubr.msk.bf16.vlgmr.msra.gmra.mrb[4].mxu0 %vm781_vm10, %v903_v51 }
 0x2a5   : > { %2084 = vmatpush3.bf16.msra.mxu0 %v982_v50  ;;  %2085 = vmatprep.mubr.msk.bf16.mxu0 %vm781_vm10, %v973_v41 }
 0x2a6   : > { %2185 = vmatprep.subr.msk.bf16.mxu0 %vm788_vm8, %v1037_v52 }
 0x2b0   : > { %2086 = vmatmul.mubr.msk.bf16.vlgmr.msra.gmra.mrb[4].mxu0 %vm781_vm10, %v974_v54  ;;  %v2244_v54 = vld [vmem:[%s2694_s6 + $0x10] sm:$0xff]  }
 0x2b1   : > { %2090 = vmatpush3.bf16.msra.mxu0 %v1051_v53  ;;  %2091 = vmatprep.mubr.msk.bf16.mxu0 %vm781_vm10, %v1041_v32 }
 0x2b2   : > { %2186 = vmatprep.subr.msk.bf16.mxu0 %vm788_vm8, %v1106_v55 }
 0x2bc   : > { %2092 = vmatmul.mubr.msk.bf16.vlgmr.msra.gmra.mrb[4].mxu0 %vm781_vm10, %v1043_v59 }
 0x2bd   : > { %2096 = vmatpush3.bf16.msra.mxu0 %v1126_v58  ;;  %2097 = vmatprep.mubr.msk.bf16.mxu0 %vm781_vm10, %v1114_v47  ;;  %v2245_v58 = vld [vmem:[%s2694_s6 + $0x38] sm:$0xff]  }
 0x2be   : > { %2119 = vmatprep.subr.bf16.mxu0 %v2241_v1 }
 0x2c8   : > { %2098 = vmatmul.mubr.msk.bf16.vlgmr.msra.gmra.mrb[4].mxu0 %vm781_vm10, %v1118_v62 }
 0x2c9   : > { %2120 = vmatpush3.bf16.msra.mxu0 %v2241_v1 }
 0x2ca   : > { %2131 = vmatprep.subr.bf16.mxu0 %v2563_v3 }
 0x39b   : > { %v2099_v5 = vpop.f32.mrb[4].mxu0 }
 0x39c   : > { %v1190_v6 = vadd.f32 %v2099_v5, %v1934_v4  ;;  %v1162_v8 = vpop.f32.mrb[5].mxu0 }
 0x39d   : > { %v1188_v9 = vadd.f32 %v1934_v4, %v1162_v8  ;;  %v2100_v10 = vpop.f32.mrb[6].mxu0  ;;  %v1717_v8 = vrot.slane %v2312_v0, 4 }
 0x39e   : > { %v1191_v11 = vadd.f32 %v2100_v10, %v1934_v4  ;;  %v1165_v12 = vpop.f32.mrb[7].mxu0  ;;  %v1194_v14 = vmax.f32 %v1190_v6, 0.0 }
 0x39f   : > { %v1189_v13 = vadd.f32 %v1934_v4, %v1165_v12  ;;  %v1192_v16 = vmax.f32 %v1188_v9, 0.0 }
 0x3a0   : > { %v1195_v15 = vmax.f32 %v1191_v11, 0.0 }
 0x3a1   : > { %v1193_v17 = vmax.f32 %v1189_v13, 0.0 }
 0x3a2   : > { %v2569_v18 = vpack.c.bf16 %v1195_v15, %v1194_v14 }
 0x3a3   : > { %v1196_v19 = vpack.c.bf16 %v1193_v17, %v1192_v16 }
 0x3a4   : > { %v1210_v20 = vshll.u32 %v2569_v18, 16  ;;  %v1214_v21 = vshrl.u32 %v2569_v18, 16  ;;  %v1344_v22 = vrot.slane %v2569_v18, 1  ;;  %v1490_v23 = vrot.slane %v2569_v18, 2 }
 0x3a5   : > { %v1203_v24 = vshrl.u32 %v1196_v19, 16  ;;  %v1205_v25 = vshll.u32 %v1196_v19, 16  ;;  %v1343_v26 = vrot.slane %v1196_v19, 1  ;;  %v1489_v27 = vrot.slane %v1196_v19, 2 }
 0x3a6   : > { %v1212_v28 = vrot.slane %v1210_v20, 1  ;;  %v1417_v29 = vrot.slane %v1214_v21, 1  ;;  %v1418_v30 = vrot.slane %v1210_v20, 2  ;;  %v1563_v31 = vrot.slane %v1214_v21, 2 }
 0x3a7   : > { %v1207_v32 = vrot.slane %v1205_v25, 1  ;;  %v1414_v33 = vrot.slane %v1203_v24, 1  ;;  %v1415_v34 = vrot.slane %v1205_v25, 2  ;;  %v1560_v35 = vrot.slane %v1203_v24, 2 }
 0x3a8   : > { %v1216_v36 = vor.u32 %v1214_v21, %v1212_v28  ;;  %v1419_v37 = vor.u32 %v1418_v30, %v1417_v29  ;;  %v1561_v38 = vrot.slane %v1205_v25, 3  ;;  %v1564_v39 = vrot.slane %v1210_v20, 3 }
 0x3a9   : > { %v1208_v40 = vor.u32 %v1207_v32, %v1203_v24  ;;  %v1416_v41 = vor.u32 %v1415_v34, %v1414_v33  ;;  %v1345_v42 = vsel %vm580_vm5, %v1343_v26, %v1344_v22  ;;  %v1709_v43 = vrot.slane %v1203_v24, 3 }
 0x3aa   : > { %v1562_v44 = vor.u32 %v1561_v38, %v1560_v35  ;;  %v1565_v45 = vor.u32 %v1564_v39, %v1563_v31  ;;  %v1710_v49 = vrot.slane %v1205_v25, 4  ;;  %v1712_v50 = vrot.slane %v1214_v21, 3 }
 0x3ab   : > { %v1213_v47 = vsel %vm420_vm6, %v1208_v40, %v1212_v28  ;;  %v1420_v48 = vsel %vm661_vm7, %v1416_v41, %v1419_v37  ;;  %v1217_v51 = vsel %vm420_vm6, %v1216_v36, %v2434_v46  ;;  %v1421_v52 = vsel %vm661_vm7, %v1419_v37, %v2469_v57 }
 0x3ac   : > { %2103 = vmatprep.mubr.msk.bf16.mxu1 %vm1224_vm12, %v1213_v47  ;;  %2121 = vmatprep.mubr.msk.bf16.mxu0 %vm1224_vm12, %v1420_v48  ;;  %v1566_v53 = vsel %vm1107_vm11, %v1562_v44, %v1565_v45  ;;  %v1713_v55 = vrot.slane %v1210_v20, 4  ;;  %v1711_v59 = vor.u32 %v1710_v49, %v1709_v43  ;;  %v1491_v57 = vsel %vm1038_vm9, %v1489_v27, %v1490_v23 }
 0x3ad   : > { %2104 = vmatmul.mubr.msk.bf16.vlgmr.msra.gmra.mrb[4].mxu1 %vm1224_vm12, %v1217_v51  ;;  %2122 = vmatmul.mubr.msk.bf16.vlgmr.msra.gmra.mrb[8].mxu0 %vm1224_vm12, %v1421_v52  ;;  %v1636_v62 = vrot.slane %v1196_v19, 3  ;;  %v1637_v1 = vrot.slane %v2569_v18, 3  ;;  %v1567_v6 = vsel %vm1107_vm11, %v1565_v45, %v2543_v61  ;;  %v1718_v61 = vor.u32 %v1717_v8, %v2539_v60 }
 0x3ae   : > { %2108 = vmatpush3.bf16.msra.mxu1 %v2557_v2  ;;  %2109 = vmatprep.mubr.msk.bf16.mxu1 %vm1224_vm12, %v1196_v19  ;;  %v1714_v63 = vor.u32 %v1713_v55, %v1712_v50  ;;  %v2246_v2 = vld [vmem:[%s2694_s6 + $0x20] sm:$0xff]   ;;  %v1346_v0 = vsel %vm580_vm5, %v1344_v22, %v2434_v46  ;;  %v1492_v10 = vsel %vm1038_vm9, %v1490_v23, %v2465_v56  ;;  %v1801_v52 = vshrl.u32 %v310_v7, 7 }
 0x3af   : > { %2133 = vmatprep.mubr.msk.bf16.mxu0 %vm1224_vm12, %v1566_v53  ;;  %2132 = vmatpush3.bf16.msra.mxu0 %v2563_v3  ;;  %v1638_v5 = vsel %vm1635_vm13, %v1636_v62, %v1637_v1  ;;  %v2247_v3 = vld [vmem:[%s2694_s6 + $0x30] sm:$0xff]   ;;  %v1640_v46 = vsel %vm1635_vm13, %v1637_v1, %v2539_v60 }
 0x3b0   : > { %2113 = vmatprep.subr.bf16.mxu1 %v2244_v54  ;;  %v1715_v4 = vsel %vm1708_vm14, %v1711_v59, %v1714_v63  ;;  %2143 = vmatprep.subr.bf16.mxu0 %v2245_v58  ;;  %v1719_v9 = vsel %vm1708_vm14, %v1714_v63, %v1718_v61  ;;  %v1959_v59 = vld [vmem:[%s2695_s7] ss:$0 sm:$0xff] }
 0x3b5   : > { %2110 = vmatmul.mubr.msk.bf16.vlgmr.msra.gmra.mrb[8].mxu1 %vm1224_vm12, %v2569_v18  ;;  %2134 = vmatmul.mubr.msk.bf16.vlgmr.msra.gmra.mrb[12].mxu0 %vm1224_vm12, %v1567_v6 }
 0x3b6   : > { %2114 = vmatpush3.bf16.msra.mxu1 %v2244_v54  ;;  %2115 = vmatprep.mubr.msk.bf16.mxu1 %vm1224_vm12, %v1345_v42 }
 0x3b7   : > { %2145 = vmatprep.mubr.msk.bf16.mxu0 %vm1224_vm12, %v1715_v4  ;;  %2144 = vmatpush3.bf16.msra.mxu0 %v2245_v58 }
 0x3b8   : > { %2125 = vmatprep.subr.bf16.mxu1 %v2246_v2 }
 0x3bd   : > { %2116 = vmatmul.mubr.msk.bf16.vlgmr.msra.gmra.mrb[12].mxu1 %vm1224_vm12, %v1346_v0  ;;  %2146 = vmatmul.mubr.msk.bf16.vlgmr.msra.gmra.mrb[16].mxu0 %vm1224_vm12, %v1719_v9 }
 0x3be   : > { %2126 = vmatpush3.bf16.msra.mxu1 %v2246_v2  ;;  %2127 = vmatprep.mubr.msk.bf16.mxu1 %vm1224_vm12, %v1491_v57  ;;  %v1803_v57 = vadd.s32 16, %v1801_v52 }
 0x3bf   : > { %2137 = vmatprep.subr.bf16.mxu1 %v2247_v3 }
 0x3c0   : > { %vm1807_vm15 = vcmp.lt.s32.totalorder %v1803_v57, 17 }
 0x3c5   : > { %2128 = vmatmul.mubr.msk.bf16.vlgmr.msra.gmra.mrb[16].mxu1 %vm1224_vm12, %v1492_v10 }
 0x3c6   : > { %2138 = vmatpush3.bf16.msra.mxu1 %v2247_v3  ;;  %2139 = vmatprep.mubr.msk.bf16.mxu1 %vm1224_vm12, %v1638_v5 }
 0x3cd   : > { %2140 = vmatmul.mubr.msk.bf16.vlgmr.msra.gmra.mrb[20].mxu1 %vm1224_vm12, %v1640_v46 }
 0x480   : > { %v2105_v11 = vpop.f32.mrb[4].mxu1  ;;  %v2123_v12 = vpop.f32.mrb[8].mxu0 }
 0x481   : > { %v1265_v13 = vpop.f32.mrb[5].mxu1  ;;  %v1468_v14 = vpop.f32.mrb[9].mxu0 }
 0x482   : > { %v2106_v15 = vpop.f32.mrb[6].mxu1  ;;  %v2124_v16 = vpop.f32.mrb[10].mxu0 }
 0x483   : > { %v1268_v17 = vpop.f32.mrb[7].mxu1  ;;  %v1471_v18 = vpop.f32.mrb[11].mxu0 }
 0x488   : > { %v2111_v19 = vpop.f32.mrb[8].mxu1  ;;  %v2135_v56 = vpop.f32.mrb[12].mxu0 }
 0x489   : > { %v1333_v20 = vadd.f32 %v2111_v19, %v2105_v11  ;;  %v1324_v21 = vpop.f32.mrb[9].mxu1  ;;  %v1614_v22 = vpop.f32.mrb[13].mxu0 }
 0x48a   : > { %v1325_v23 = vadd.f32 %v1324_v21, %v1265_v13  ;;  %v2112_v24 = vpop.f32.mrb[10].mxu1  ;;  %v2136_v25 = vpop.f32.mrb[14].mxu0 }
 0x48b   : > { %v1327_v26 = vpop.f32.mrb[11].mxu1  ;;  %v1617_v60 = vpop.f32.mrb[15].mxu0 }
 0x48c   : > { %v1328_v27 = vadd.f32 %v1327_v26, %v1268_v17 }
 0x490   : > { %v2117_v28 = vpop.f32.mrb[12].mxu1  ;;  %v2147_v29 = vpop.f32.mrb[16].mxu0 }
 0x491   : > { %v1410_v30 = vadd.f32 %v2117_v28, %v1333_v20  ;;  %v1393_v31 = vpop.f32.mrb[13].mxu1  ;;  %v1766_v32 = vpop.f32.mrb[17].mxu0 }
 0x492   : > { %v1408_v33 = vadd.f32 %v1393_v31, %v1325_v23  ;;  %v2118_v34 = vpop.f32.mrb[14].mxu1  ;;  %v2148_v35 = vpop.f32.mrb[18].mxu0 }
 0x493   : > { %v1396_v36 = vpop.f32.mrb[15].mxu1  ;;  %v1769_v37 = vpop.f32.mrb[19].mxu0  ;;  %v1485_v38 = vadd.f32 %v2123_v12, %v1410_v30 }
 0x494   : > { %v1409_v39 = vadd.f32 %v1396_v36, %v1328_v27  ;;  %v1483_v40 = vadd.f32 %v1468_v14, %v1408_v33 }
 0x496   : > { %v1484_v41 = vadd.f32 %v1471_v18, %v1409_v39 }
 0x498   : > { %v2129_v42 = vpop.f32.mrb[16].mxu1 }
 0x499   : > { %v1556_v43 = vadd.f32 %v2129_v42, %v1485_v38  ;;  %v1539_v44 = vpop.f32.mrb[17].mxu1 }
 0x49a   : > { %v1554_v45 = vadd.f32 %v1539_v44, %v1483_v40  ;;  %v2130_v47 = vpop.f32.mrb[18].mxu1 }
 0x49b   : > { %v1542_v48 = vpop.f32.mrb[19].mxu1  ;;  %v1631_v49 = vadd.f32 %v2135_v56, %v1556_v43 }
 0x49c   : > { %v1555_v50 = vadd.f32 %v1542_v48, %v1484_v41  ;;  %v1629_v51 = vadd.f32 %v1614_v22, %v1554_v45 }
 0x49e   : > { %v1630_v53 = vadd.f32 %v1617_v60, %v1555_v50 }
 0x4a0   : > { %v2141_v54 = vpop.f32.mrb[20].mxu1 }
 0x4a1   : > { %v1704_v55 = vadd.f32 %v2141_v54, %v1631_v49  ;;  %v1687_v58 = vpop.f32.mrb[21].mxu1 }
 0x4a2   : > { %v1702_v62 = vadd.f32 %v1687_v58, %v1629_v51  ;;  %v2142_v63 = vpop.f32.mrb[22].mxu1 }
 0x4a3   : > { %v1783_v1 = vadd.f32 %v2147_v29, %v1704_v55  ;;  %v1690_v4 = vpop.f32.mrb[23].mxu1 }
 0x4a4   : > { %v1781_v5 = vadd.f32 %v1766_v32, %v1702_v62  ;;  %v1703_v6 = vadd.f32 %v1690_v4, %v1630_v53 }
 0x4a5   : > { %v1794_v2 = vadd.f32 %v1959_v59, %v1783_v1 }
 0x4a6   : > { %v1792_v7 = vadd.f32 %v1959_v59, %v1781_v5  ;;  %v1782_v8 = vadd.f32 %v1769_v37, %v1703_v6 }
 0x4a7   : > { %v1798_v61 = vmax.f32 %v1794_v2, 0.0 }
 0x4a8   : > { %v1793_v3 = vadd.f32 %v1959_v59, %v1782_v8  ;;  %v1796_v9 = vmax.f32 %v1792_v7, 0.0 }
 0x4a9   : > { %v1811_v0 = vsel %vm1807_vm15, %v1798_v61, 0.0 }
 0x4aa   : > { %v1797_v10 = vmax.f32 %v1793_v3, 0.0  ;;  %v1814_v46 = vmax.f32 %v1811_v0, 0.0 }
 0x4ac   : > { %v1813_v11 = vmax.f32 %v1796_v9, %v1797_v10 }
 0x4ae   : > { %v1815_v12 = vmax.f32 %v1813_v11, %v1814_v46 }
 0x4b0   : > { %v1816_v13 = vrot.slane %v1815_v12, 4 }
 0x4b2   : > { %v1817_v14 = vmax.f32 %v1815_v12, %v1816_v13 }
 0x4b4   : > { %v1818_v15 = vrot.slane %v1817_v14, 2 }
 0x4b6   : > { %v1819_v16 = vmax.f32 %v1817_v14, %v1818_v15 }
 0x4b8   : > { %v1820_v17 = vrot.slane %v1819_v16, 1 }
 0x4ba   : > { %v1821_v18 = vmax.f32 %v1819_v16, %v1820_v17 }
 0x4bc   : > { %1822 = vst [vmem:[%s298_s26] sm:$0x1] %v1821_v18 }
 0x4bd   : > { %2261 = shalt.err (!%p2258_p3)
}
 0x4be   : > { %s2262_s22 = scalar_lea.hbm %s2646_s17, 16  ;;  %s2266_s25 = scalar_lea.hbm %s2696_s8, 32 }
 0x4bf   : > { %p2263_p4 = scmp.ne.s32.totalorder %s2646_s17, %s2262_s22  ;;  %p2267_p9 = scmp.lt.u32.totalorder %s2646_s17, %s2696_s8 }
 0x4c0   : > { %p2268_p10 = scmp.lt.u32.totalorder %s2266_s25, %s2262_s22  ;;  %p2270_p12 = scmp.lt.u32.totalorder %s2262_s22, %s2646_s17 }
 0x4c1   : > { %p2264_p7 = pnand %p2263_p4, %p2398_p5 }
 0x4c2   : > { %p2269_p11 = por %p2268_p10, %p2267_p9 }
 0x4c3   : > { %p2265_p8 = pneg %p2264_p7 }
 0x4c4   : > { %p2271_p13 = por %p2270_p12, %p2269_p11 }
 0x4c6   : > { %p2272_p0 = pnand %p2271_p13, %p2265_p8 }
 0x4c8   : > { %2275 = shalt.err (!%p2272_p0)
}
 0x4c9   : > { %2187 = dma.vmem_to_hbm [thread:$0]  (%p2398_p5), %s2648_s10, 16, %s2646_s17, %s1824_s18  }
 0x4ca PF: > { %p2193_p1 = scmp.ge.s32.totalorder %s2310_s30, 2  ;;  %s1848_s13 = sand.u32 1, %s2298_s27  }
 0x4cb   : > { %s1849_s19 = scalar_lea.sflag [#allocation3], %s1848_s13 }
 0x4cc   : > { %p2190_p2 = pnand %p2193_p1, %p2402_p6 }
 0x4ce   : > { %2293 = dma.done.wait (!%p2190_p2), %s1849_s19, 16  }
 0x4cf   : > { %2295 = vsyncadd (!%p2190_p2), %s1849_s19, 4294967280  ;;  %p18_p3 = scmp.ge.s32.totalorder %s2385_s11, 4   ;;  %s2699_s27 = smov %s2302_s28 }
 0x4d0   : > { %s2700_s28 = smov %s2306_s29  ;;  %s2701_s29 = smov %s2396_s14 }
 0x4d1   : > { %s2702_s30 = smov %s2385_s11  ;;  %20 = sbr.rel (!%p18_p3) target bundleno = 3 (0x3), region = 87 }
 0x4d8   :  { %1853 = vsyncpa [#allocation3], 1 }
 0x4d9   :  { %1855 = vsyncpa [#allocation3 + $0x1], 1 }

</bundles_post_ra>
